<compile_context>
chip_gen: v7x
topology: tpu7x:2x2x1
jax: 0.10.0
libtpu: 0.0.40
codegen_flags: <defaults>
</compile_context>

<pallas_src>
import functools

import numpy as np
import jax
import jax.numpy as jnp
from jax import lax
from jax.experimental import pallas as pl
from jax.experimental.pallas import tpu as pltpu

LRELU_SLOPE = 0.2
MXU_DTYPE = jnp.bfloat16            # MXU operand / inter-kernel activation dtype


def _pick_vmem_limit():
    # Raise the scoped-VMEM budget on 128-MiB parts (v5e/v6e); stay safe on v7x.
    try:
        cap = pltpu.get_tpu_info().vmem_capacity_bytes
        return int(min(cap * 3 // 4, 100 * 1024 * 1024))
    except Exception:
        return 32 * 1024 * 1024


VMEM_LIMIT = _pick_vmem_limit()
_VMEM = pl.BlockSpec(memory_space=pltpu.MemorySpace.VMEM)


def _round_up(x, m):
    return ((x + m - 1) // m) * m


# ----------------------------------------------------------------------------
# Activation layout helpers.
# A feature map of resolution HxW travels between kernels as a flattened,
# spatially pre-padded image with 8-aligned row pitch P = round_up(W+2, 8):
#   value(i, j) lives at flat index (i + 2) * P + j     (bf16, lane-dense C)
# rows [0, 2P) and [(H+2)P, (H+4)P) and columns [W, P) are zero => they double
# as the zero padding for the next 3x3 conv, so no external pad pass is needed.
# ----------------------------------------------------------------------------
def to_padded_layout(x_nhwc, pitch):
    n, h, w, c = x_nhwc.shape
    xp = jnp.pad(x_nhwc, ((0, 0), (2, 2), (0, pitch - w), (0, 0)))
    return xp.reshape(n, (h + 4) * pitch, c)


def _avgpool2(x):
    n, h, w, c = x.shape
    return x.reshape(n, h // 2, 2, w // 2, 2, c).mean(axis=(2, 4))


# ----------------------------------------------------------------------------
# Kernel 1: fused DisGeneralConvBlock
#   conv3x3 + LReLU  ->  VMEM scratch  ->  conv3x3 + LReLU  ->  2x2 avg pool
#   (+ optional fused fade-in residual add).  One grid step = one sample.
# ----------------------------------------------------------------------------
def _block_kernel(x_ref, w1_ref, b1_ref, w2_ref, b2_ref, hp_ref, *rest,
                  h_img, w_img, p_in, p_out, has_res):
    if has_res:
        res_ref, o_ref, y1_ref = rest
    else:
        o_ref, y1_ref = rest
        res_ref = None

    cpad = o_ref.shape[2]
    ho = h_img // 2
    chunk = 2 * p_in                     # 2 image rows per chunk

    # Zero only the padding borders (the interior is fully overwritten below).
    o_ref[0, 0:2 * p_out, :] = jnp.zeros((2 * p_out, cpad), o_ref.dtype)
    o_ref[0, (ho + 2) * p_out:, :] = jnp.zeros((2 * p_out, cpad), o_ref.dtype)
    y1_ref[0:2 * p_in, :] = jnp.zeros((2 * p_in, cpad), y1_ref.dtype)
    y1_ref[(h_img + 2) * p_in:, :] = jnp.zeros((2 * p_in, cpad), y1_ref.dtype)

    # Column-validity mask for conv1's extended rows (hoisted out of the loop):
    # columns >= W of each image row are garbage and must be stored as zeros so
    # they act as conv2's zero padding.
    idx = lax.broadcasted_iota(jnp.int32, (chunk, 1), 0)
    col = jnp.where(idx >= p_in, idx - p_in, idx)
    mask = (col < w_img).astype(jnp.float32)

    # Tap offsets for a 3x3 conv in the pre-padded layout (data at (i+2)*P + j).
    taps = [(di + 1) * p_in + dj - 1 for di in range(3) for dj in range(3)]

    def conv1_step(c, carry):
        base = pl.multiple_of(c * chunk, 8)
        acc = jnp.zeros((chunk, cpad), jnp.float32)
        for t, off in enumerate(taps):          # register-held accumulation
            lhs = x_ref[0, pl.ds(base + off, chunk), :].astype(MXU_DTYPE)
            acc = acc + jnp.dot(lhs, w1_ref[t],
                                preferred_element_type=jnp.float32)
        val = acc + b1_ref[...]
        val = jnp.where(val >= 0.0, val, val * LRELU_SLOPE) * mask
        dst = pl.multiple_of(c * chunk + 2 * p_in, 8)     # aligned store
        y1_ref[pl.ds(dst, chunk), :] = val.astype(y1_ref.dtype)
        return carry

    lax.fori_loop(0, ho, conv1_step, 0)

    def conv2_step(c, carry):
        base = pl.multiple_of(c * chunk, 8)
        acc = jnp.zeros((chunk, cpad), jnp.float32)
        for t, off in enumerate(taps):
            lhs = y1_ref[pl.ds(base + off, chunk), :]
            acc = acc + jnp.dot(lhs, w2_ref[t],
                                preferred_element_type=jnp.float32)
        val = acc + b2_ref[...]
        val = jnp.where(val >= 0.0, val, val * LRELU_SLOPE)
        # 2x2 average pool: vertical pair add in registers, horizontal stride-2
        # reduction as a tiny MXU matmul with the constant pooling matrix.
        vsum = val[0:p_in, :] + val[p_in:chunk, :]
        pooled = jnp.dot(hp_ref[...], vsum, preferred_element_type=jnp.float32)
        out_off = pl.multiple_of((c + 2) * p_out, 8)
        if has_res:   # fused fade-in: (1-alpha) already folded into the residual
            pooled = pooled + res_ref[0, pl.ds(out_off, p_out), :].astype(jnp.float32)
        o_ref[0, pl.ds(out_off, p_out), :] = pooled.astype(o_ref.dtype)
        return carry

    lax.fori_loop(0, ho, conv2_step, 0)


def fused_block(x_lay, w1, b1, w2, b2, h_img, w_img, res=None):
    n, s_in, cin_a = x_lay.shape
    cpad = w2.shape[2]
    p_in = _round_up(w_img + 2, 8)
    assert s_in == (h_img + 4) * p_in, (s_in, h_img, w_img, p_in)
    ho, wo = h_img // 2, w_img // 2
    p_out = _round_up(wo + 2, 8)
    s_out = (ho + 4) * p_out

    hp = np.zeros((p_out, p_in), np.float32)       # pooling / layout matrix
    for q in range(wo):
        hp[q, 2 * q] = 0.25
        hp[q, 2 * q + 1] = 0.25
    hp = jnp.asarray(hp)

    in_specs = [
        pl.BlockSpec((1, s_in, cin_a), lambda i: (i, 0, 0)),
        pl.BlockSpec((9, cin_a, cpad), lambda i: (0, 0, 0)),
        pl.BlockSpec((1, cpad), lambda i: (0, 0)),
        pl.BlockSpec((9, cpad, cpad), lambda i: (0, 0, 0)),
        pl.BlockSpec((1, cpad), lambda i: (0, 0)),
        pl.BlockSpec((p_out, p_in), lambda i: (0, 0)),
    ]
    args = [x_lay, w1, b1, w2, b2, hp]
    if res is not None:
        in_specs.append(pl.BlockSpec((1, s_out, cpad), lambda i: (i, 0, 0)))
        args.append(res)

    kernel = functools.partial(_block_kernel, h_img=h_img, w_img=w_img,
                               p_in=p_in, p_out=p_out, has_res=res is not None)
    return pl.pallas_call(
        kernel,
        out_shape=jax.ShapeDtypeStruct((n, s_out, cpad), MXU_DTYPE),
        grid=(n,),
        in_specs=in_specs,
        out_specs=pl.BlockSpec((1, s_out, cpad), lambda i: (i, 0, 0)),
        scratch_shapes=[pltpu.VMEM(((h_img + 4) * p_in, cpad), MXU_DTYPE)],
        compiler_params=pltpu.CompilerParams(
            dimension_semantics=("parallel",),
            vmem_limit_bytes=VMEM_LIMIT),
    )(*args)


# ----------------------------------------------------------------------------
# Kernel 2: single 3x3 conv + bias + LeakyReLU (final block's conv1, 4x4 map)
# ----------------------------------------------------------------------------
def _conv3x3_kernel(x_ref, w_ref, b_ref, o_ref, *, h_img, p_in):
    cpad = o_ref.shape[2]
    r = h_img * p_in
    taps = [(di + 1) * p_in + dj - 1 for di in range(3) for dj in range(3)]
    acc = jnp.zeros((r, cpad), jnp.float32)
    for t, off in enumerate(taps):
        lhs = x_ref[0, off:off + r, :].astype(MXU_DTYPE)
        acc = acc + jnp.dot(lhs, w_ref[t], preferred_element_type=jnp.float32)
    val = acc + b_ref[...]
    o_ref[0] = jnp.where(val >= 0.0, val, val * LRELU_SLOPE).astype(o_ref.dtype)


def conv3x3_plain(x_lay, w, b, h_img, w_img):
    n, s_in, cpad = x_lay.shape
    p_in = _round_up(w_img + 2, 8)
    assert s_in == (h_img + 4) * p_in
    r_out = h_img * p_in
    return pl.pallas_call(
        functools.partial(_conv3x3_kernel, h_img=h_img, p_in=p_in),
        out_shape=jax.ShapeDtypeStruct((n, r_out, cpad), MXU_DTYPE),
        grid=(n,),
        in_specs=[pl.BlockSpec((1, s_in, cpad), lambda i: (i, 0, 0)),
                  pl.BlockSpec((9, cpad, cpad), lambda i: (0, 0, 0)),
                  pl.BlockSpec((1, cpad), lambda i: (0, 0))],
        out_specs=pl.BlockSpec((1, r_out, cpad), lambda i: (i, 0, 0)),
        compiler_params=pltpu.CompilerParams(
            dimension_semantics=("parallel",),
            vmem_limit_bytes=VMEM_LIMIT),
    )(x_lay, w, b)


# ----------------------------------------------------------------------------
# Kernel 3: M-tiled matmul + bias (+ optional LReLU) -- 1x1 fromRGB convs
# ----------------------------------------------------------------------------
def _matmul_kernel(x_ref, w_ref, b_ref, o_ref, *, slope):
    acc = jnp.dot(x_ref[...].astype(MXU_DTYPE), w_ref[...],
                  preferred_element_type=jnp.float32)
    acc = acc + b_ref[...]
    if slope is not None:
        acc = jnp.where(acc >= 0.0, acc, acc * slope)
    o_ref[...] = acc.astype(o_ref.dtype)


def matmul_bias_act(x2d, w2d, bias2d, slope=None, out_dtype=jnp.float32,
                    tile_m=512):
    m, k = x2d.shape
    n = w2d.shape[1]
    tm = min(tile_m, _round_up(m, 8))
    m_pad = _round_up(m, tm)
    if m_pad != m:
        x2d = jnp.pad(x2d, ((0, m_pad - m), (0, 0)))
    out = pl.pallas_call(
        functools.partial(_matmul_kernel, slope=slope),
        out_shape=jax.ShapeDtypeStruct((m_pad, n), out_dtype),
        grid=(m_pad // tm,),
        in_specs=[pl.BlockSpec((tm, k), lambda i: (i, 0)),
                  pl.BlockSpec((k, n), lambda i: (0, 0)),
                  pl.BlockSpec((1, n), lambda i: (0, 0))],
        out_specs=pl.BlockSpec((tm, n), lambda i: (i, 0)),
        compiler_params=pltpu.CompilerParams(
            dimension_semantics=("parallel",),
            vmem_limit_bytes=VMEM_LIMIT),
    )(x2d, w2d, bias2d)
    return out[:m] if m_pad != m else out


# ----------------------------------------------------------------------------
# Kernel 4: MinibatchStdDev statistic (scalar)
# ----------------------------------------------------------------------------
def _mbstd_kernel(x_ref, o_ref):
    x = x_ref[...]                                  # [batch, H*W*C_true]
    mu = jnp.mean(x, axis=0, keepdims=True)
    var = jnp.mean((x - mu) ** 2, axis=0, keepdims=True)
    std = jnp.sqrt(var + 1e-8)
    o_ref[...] = jnp.mean(std, axis=1, keepdims=True)


def mbstd_pallas(x2d):
    return pl.pallas_call(
        _mbstd_kernel,
        out_shape=jax.ShapeDtypeStruct((1, 1), jnp.float32),
        in_specs=[_VMEM],
        out_specs=_VMEM,
        compiler_params=pltpu.CompilerParams(vmem_limit_bytes=VMEM_LIMIT),
    )(x2d)


# ----------------------------------------------------------------------------
# Kernel 5: fused final head (4x4 full-extent conv + LReLU + 1x1 conv)
# ----------------------------------------------------------------------------
def _final_head_kernel(x_ref, w2_ref, b2_ref, w3_ref, b3_ref, o_ref):
    h = jnp.dot(x_ref[...].astype(MXU_DTYPE), w2_ref[...],
                preferred_element_type=jnp.float32)
    h = h + b2_ref[...]
    h = jnp.where(h >= 0.0, h, h * LRELU_SLOPE)
    out = jnp.dot(h.astype(MXU_DTYPE), w3_ref[...],
                  preferred_element_type=jnp.float32)
    o_ref[...] = out + b3_ref[...]


def final_head_pallas(x2d, head):
    n = x2d.shape[0]
    ncol = head["w3"].shape[1]
    return pl.pallas_call(
        _final_head_kernel,
        out_shape=jax.ShapeDtypeStruct((n, ncol), jnp.float32),
        in_specs=[_VMEM] * 5,
        out_specs=_VMEM,
        compiler_params=pltpu.CompilerParams(vmem_limit_bytes=VMEM_LIMIT),
    )(x2d, head["w2"], head["b2"], head["w3"], head["b3"])


# ----------------------------------------------------------------------------
# Parameters (deterministic; mirrors Discriminator.__init__ with use_eql=True)
# ----------------------------------------------------------------------------
def _init_conv(key, kh, kw, cin, cout):
    w = jax.random.normal(key, (kh, kw, cin, cout), jnp.float32)   # HWIO
    b = jnp.zeros((cout,), jnp.float32)                            # eq-lr bias = 0
    scale = (2.0 / (kh * kw * cin)) ** 0.5                         # sqrt(2/fan_in)
    return {"w": w, "b": b, "scale": scale}


def _prep_conv3x3(p, cin_arr, cpad):
    kh, kw, cin, cout = p["w"].shape
    w = (p["w"] * p["scale"]).reshape(kh * kw, cin, cout)
    wt = jnp.zeros((kh * kw, cin_arr, cpad), jnp.float32).at[:, :cin, :cout].set(w)
    b = jnp.zeros((1, cpad), jnp.float32).at[0, :cout].set(p["b"])
    return {"w": wt.astype(MXU_DTYPE), "b": b}


def _prep_conv1x1(p, cpad):
    cin, cout = p["w"].shape[2], p["w"].shape[3]
    w = p["w"][0, 0] * p["scale"]
    wt = jnp.zeros((cin, cpad), jnp.float32).at[:, :cout].set(w).astype(MXU_DTYPE)
    b = jnp.zeros((1, cpad), jnp.float32).at[0, :cout].set(p["b"])
    return {"w": wt, "b": b}


def _prep_final_head(p2, p3, cpad):
    kh, kw, cin2, cout2 = p2["w"].shape          # (4, 4, fs, fs)
    w2 = (p2["w"] * p2["scale"]).astype(MXU_DTYPE)
    w2p = jnp.zeros((kh, kw, cpad, cpad), MXU_DTYPE).at[:, :, :cin2, :cout2].set(w2)
    w2p = w2p.reshape(kh * kw * cpad, cpad)
    b2 = jnp.zeros((1, cpad), jnp.float32).at[0, :cout2].set(p2["b"])
    cin3, cout3 = p3["w"].shape[2], p3["w"].shape[3]      # (fs, 1)
    w3 = (p3["w"] * p3["scale"]).astype(MXU_DTYPE).reshape(cin3, cout3)
    w3p = jnp.zeros((cpad, cpad), MXU_DTYPE).at[:cin3, :cout3].set(w3)
    b3 = jnp.zeros((1, cpad), jnp.float32).at[0, :cout3].set(p3["b"])
    return {"w2": w2p, "b2": b2, "w3": w3p, "b3": b3}


def build_params(key, height=3, feature_size=16):
    assert feature_size != 0 and feature_size & (feature_size - 1) == 0
    if height >= 4:
        assert feature_size >= 2 ** (height - 4)
    keys = iter(jax.random.split(key, 4 * height + 8))

    rgb_channels = [feature_size]
    for i in range(height - 1):
        rgb_channels.append(feature_size // (2 ** (i - 2)) if i > 2 else feature_size)
    rgb_raw = [_init_conv(next(keys), 1, 1, 3, c) for c in rgb_channels]

    layers_raw = []
    for i in range(height - 1):
        if i > 2:
            cin = feature_size // (2 ** (i - 2))
            cout = feature_size // (2 ** (i - 3))
        else:
            cin = cout = feature_size
        layers_raw.append({"conv1": _init_conv(next(keys), 3, 3, cin, cin),
                           "conv2": _init_conv(next(keys), 3, 3, cin, cout)})

    final_raw = {"conv1": _init_conv(next(keys), 3, 3, feature_size + 1, feature_size),
                 "conv2": _init_conv(next(keys), 4, 4, feature_size, feature_size),
                 "conv3": _init_conv(next(keys), 1, 1, feature_size, 1)}

    cpad = max(128, _round_up(feature_size + 1, 128))     # lane-dense channels

    rgb = [_prep_conv1x1(p, cpad) for p in rgb_raw]
    layers = []
    for l in layers_raw:
        c1 = _prep_conv3x3(l["conv1"], cpad, cpad)
        c2 = _prep_conv3x3(l["conv2"], cpad, cpad)
        layers.append({"w1": c1["w"], "b1": c1["b"], "w2": c2["w"], "b2": c2["b"]})
    fc1 = _prep_conv3x3(final_raw["conv1"], cpad, cpad)
    final = {"w1": fc1["w"], "b1": fc1["b"],
             "head": _prep_final_head(final_raw["conv2"], final_raw["conv3"], cpad)}
    return {"rgb": rgb, "layers": layers, "final": final,
            "height": height, "cpad": cpad, "feature_size": feature_size,
            "raw": {"rgb": rgb_raw, "layers": layers_raw, "final": final_raw}}


# ----------------------------------------------------------------------------
# fromRGB folding: conv1' = conv1 o fromRGB.  The fromRGB bias rides on an
# extra constant "ones" input channel (0 in the zero-padded ring), which keeps
# the composition exact at the image border for arbitrary biases.
# ----------------------------------------------------------------------------
def _fold_fromrgb_into_conv1(raw_rgb, raw_c1, cpad):
    w_rgb = raw_rgb["w"][0, 0] * raw_rgb["scale"]          # [3, c]
    b_rgb = raw_rgb["b"]                                    # [c]
    w1 = raw_c1["w"] * raw_c1["scale"]                      # [3,3,c,cout]
    w_x = jnp.einsum("rc,hwco->hwro", w_rgb, w1)            # [3,3,3,cout]
    w_one = jnp.einsum("c,hwco->hwo", b_rgb, w1)[:, :, None, :]
    w_fold = jnp.concatenate([w_x, w_one], axis=2)          # [3,3,4,cout]
    cout = w_fold.shape[-1]
    wt = w_fold.reshape(9, 4, cout)
    wt_p = jnp.zeros((9, 4, cpad), jnp.float32).at[:, :, :cout].set(wt)
    b = jnp.zeros((1, cpad), jnp.float32).at[0, :cout].set(raw_c1["b"])
    return wt_p.astype(MXU_DTYPE), b


# ----------------------------------------------------------------------------
# Final stage: MinibatchStdDev -> conv3x3 -> (4x4 conv + 1x1 conv) head
# ----------------------------------------------------------------------------
def _final_stage(params, y_lay, h4, w4):
    assert (h4, w4) == (4, 4)
    n = y_lay.shape[0]
    cpad = params["cpad"]
    c_true = params["feature_size"]
    p4 = 8
    idx_pad = np.array([(i + 2) * p4 + j for i in range(4) for j in range(4)],
                       np.int32)
    y_valid = y_lay[:, idx_pad, :c_true].astype(jnp.float32).reshape(n, -1)
    std = mbstd_pallas(y_valid)                              # [1, 1]
    # Write the minibatch-std channel at slot c_true of the valid pixels only.
    # Padded lanes/positions stay exactly zero (weight columns beyond cout are
    # zero-padded), which is what the reference's zero padding expects.
    y_lay = y_lay.at[:, idx_pad, c_true].set(std[0, 0].astype(y_lay.dtype))
    fin = params["final"]
    yb = conv3x3_plain(y_lay, fin["w1"], fin["b1"], h_img=4, w_img=4)
    idx_ext = np.array([i * p4 + j for i in range(4) for j in range(4)], np.int32)
    y_head = yb[:, idx_ext, :].reshape(n, 16 * cpad)
    out = final_head_pallas(y_head, fin["head"])             # [n, cpad]
    return out[:, 0]                                         # == y.view(-1)


# ----------------------------------------------------------------------------
# Forward pass (Pallas)
# ----------------------------------------------------------------------------
def discriminator_forward(params, x_nchw, height, alpha):
    assert height < params["height"]
    cpad = params["cpad"]
    x = jnp.transpose(x_nchw, (0, 2, 3, 1)).astype(jnp.float32)   # NCHW -> NHWC
    n, h, w, _ = x.shape
    alpha = jnp.float32(alpha)

    if height > 0:
        # Residual: avg-pool the RGB image first (exact commute with a 1x1
        # conv), then fromRGB with (1-alpha) folded into its weights/bias.
        xr = _avgpool2(x)
        rp = params["rgb"][height - 1]
        w_res = (rp["w"].astype(jnp.float32) * (1.0 - alpha)).astype(MXU_DTYPE)
        b_res = rp["b"] * (1.0 - alpha)
        res = matmul_bias_act(xr.reshape(-1, 3), w_res, b_res,
                              slope=None, out_dtype=MXU_DTYPE)
        res = res.reshape(n, h // 2, w // 2, cpad)
        res_lay = to_padded_layout(res, _round_up(w // 2 + 2, 8))

        # Straight: fromRGB folded into the block's conv1; alpha folded into
        # conv2 (LeakyReLU is positively homogeneous); lerp fused in-kernel.
        raw = params["raw"]
        w1f, b1f = _fold_fromrgb_into_conv1(raw["rgb"][height],
                                            raw["layers"][height - 1]["conv1"],
                                            cpad)
        blk = params["layers"][height - 1]
        w2a = (blk["w2"].astype(jnp.float32) * alpha).astype(MXU_DTYPE)
        b2a = blk["b2"] * alpha
        ones = jnp.ones((n, h, w, 1), jnp.float32)      # carries the fromRGB bias
        x_aug = jnp.concatenate([x, ones], axis=-1).astype(MXU_DTYPE)
        x_lay = to_padded_layout(x_aug, _round_up(w + 2, 8))

        y = fused_block(x_lay, w1f, b1f, w2a, b2a, h, w, res=res_lay)
        cur_h, cur_w = h // 2, w // 2
        for idx in range(height - 2, -1, -1):
            blk = params["layers"][idx]
            y = fused_block(y, blk["w1"], blk["b1"], blk["w2"], blk["b2"],
                            cur_h, cur_w)
            cur_h, cur_w = cur_h // 2, cur_w // 2
    else:
        rp = params["rgb"][0]
        y0 = matmul_bias_act(x.reshape(-1, 3), rp["w"], rp["b"],
                             slope=None, out_dtype=MXU_DTYPE)
        y = to_padded_layout(y0.reshape(n, h, w, cpad), _round_up(w + 2, 8))
        cur_h, cur_w = h, w

    return _final_stage(params, y, cur_h, cur_w)


# ----------------------------------------------------------------------------
# Pure-JAX reference (bf16 operands / f32 accumulation, mirroring the kernels)
# ----------------------------------------------------------------------------
def _ref_conv(x, p, pad, slope=None):
    w = (p["w"] * p["scale"]).astype(MXU_DTYPE)
    y = lax.conv_general_dilated(x.astype(MXU_DTYPE), w, (1, 1),
                                 [(pad, pad), (pad, pad)],
                                 dimension_numbers=("NHWC", "HWIO", "NHWC"),
                                 preferred_element_type=jnp.float32)
    y = y + p["b"].reshape(1, 1, 1, -1)
    if slope is not None:
        y = jnp.where(y >= 0, y, slope * y)
    return y


def _ref_avgpool2(x):
    n, h, w, c = x.shape
    return x.reshape(n, h // 2, 2, w // 2, 2, c).mean(axis=(2, 4))


def _ref_block(x, p):
    y = _ref_conv(x, p["conv1"], 1, LRELU_SLOPE)
    y = _ref_conv(y, p["conv2"], 1, LRELU_SLOPE)
    return _ref_avgpool2(y)


def _ref_mbstd(x):
    mu = jnp.mean(x, axis=0, keepdims=True)
    std = jnp.sqrt(jnp.mean((x - mu) ** 2, axis=0) + 1e-8)
    val = jnp.mean(std)
    feat = jnp.broadcast_to(val, x.shape[:3] + (1,))
    return jnp.concatenate([x, feat], axis=-1)


def reference_forward(params, x_nchw, height, alpha):
    raw = params["raw"]
    x = jnp.transpose(x_nchw, (0, 2, 3, 1)).astype(jnp.float32)
    if height > 0:
        residual = _ref_conv(_ref_avgpool2(x), raw["rgb"][height - 1], 0)
        straight = _ref_block(_ref_conv(x, raw["rgb"][height], 0),
                              raw["layers"][height - 1])
        y = alpha * straight + (1.0 - alpha) * residual
        for idx in range(height - 2, -1, -1):
            y = _ref_block(y, raw["layers"][idx])
    else:
        y = _ref_conv(x, raw["rgb"][0], 0)
    y = _ref_mbstd(y)
    y = _ref_conv(y, raw["final"]["conv1"], 1, LRELU_SLOPE)
    y = _ref_conv(y, raw["final"]["conv2"], 0, LRELU_SLOPE)
    y = _ref_conv(y, raw["final"]["conv3"], 0, None)
    return y.reshape(-1)


# ----------------------------------------------------------------------------
if __name__ == "__main__":
    key = jax.random.PRNGKey(0)
    k_params, k_x = jax.random.split(key)

    TOTAL_HEIGHT = 3      # Discriminator(height=3, feature_size=16, use_eql=True)
    FEATURE_SIZE = 16
    params = build_params(k_params, TOTAL_HEIGHT, FEATURE_SIZE)

    # NCHW input, RGB, resolution 4 * 2**height = 16 for current height = 2
    x = jax.random.normal(k_x, (2, 3, 16, 16), jnp.float32)
    cur_height = 2
    alpha = 0.6

    out = jax.block_until_ready(discriminator_forward(params, x, cur_height, alpha))
    ref = jax.block_until_ready(reference_forward(params, x, cur_height, alpha))

    assert out.shape == (2,), out.shape
    # bf16 MXU operands / bf16 inter-kernel activations (f32 accumulation) in
    # both paths -> percent-level tolerance.
    assert jnp.allclose(out, ref, atol=5e-2, rtol=5e-2), (out, ref)

    print("KERNEL_OK")
</pallas_src>

<mosaic_0001>
module attributes {stable_mosaic.version = 11 : i64} {
  func.func @_matmul_kernel(%arg0: i32, %arg1: memref<128x3xf32, #tpu.memory_space<vmem>>, %arg2: memref<3x128xbf16, #tpu.memory_space<vmem>>, %arg3: memref<1x128xf32, #tpu.memory_space<vmem>>, %arg4: memref<128x128xbf16, #tpu.memory_space<vmem>>) attributes {dimension_semantics = [#tpu.dimension_semantics<parallel>], iteration_bounds = array<i64: 1>, scalar_prefetch = 0 : i64, scratch_operands = 0 : i64, tpu.core_type = #tpu.core_type<tc>, window_params = [{transform_indices = @transform_0, window_bounds = array<i64: 128, 3>}, {pipeline_mode = #tpu.pipeline_mode<synchronous>, transform_indices = @transform_1, window_bounds = array<i64: 3, 128>}, {pipeline_mode = #tpu.pipeline_mode<synchronous>, transform_indices = @transform_2, window_bounds = array<i64: 1, 128>}, {transform_indices = @transform_3, window_bounds = array<i64: 128, 128>}]} {
    %c0 = arith.constant 0 : index
    %c0_0 = arith.constant 0 : index
    %0 = vector.load %arg1[%c0, %c0_0] : memref<128x3xf32, #tpu.memory_space<vmem>>, vector<128x3xf32>
    %1 = arith.truncf %0 : vector<128x3xf32> to vector<128x3xbf16>
    %c0_1 = arith.constant 0 : index
    %c0_2 = arith.constant 0 : index
    %2 = vector.load %arg2[%c0_1, %c0_2] : memref<3x128xbf16, #tpu.memory_space<vmem>>, vector<3x128xbf16>
    %cst = arith.constant dense<0.000000e+00> : vector<128x128xf32>
    %3 = tpu.matmul %1, %2, %cst {dimension_numbers = #tpu.dot_dimension_numbers<[1], [0], [0], [1], [0, 0, 1, 1], [], []>} : vector<128x3xbf16>, vector<3x128xbf16>, vector<128x128xf32> -> vector<128x128xf32>
    %c0_3 = arith.constant 0 : index
    %c0_4 = arith.constant 0 : index
    %4 = vector.load %arg3[%c0_3, %c0_4] : memref<1x128xf32, #tpu.memory_space<vmem>>, vector<1x128xf32>
    %5 = vector.broadcast %4 : vector<1x128xf32> to vector<128x128xf32>
    %6 = arith.addf %3, %5 : vector<128x128xf32>
    %7 = arith.truncf %6 : vector<128x128xf32> to vector<128x128xbf16>
    %c0_5 = arith.constant 0 : index
    %c0_6 = arith.constant 0 : index
    %8 = vector.load %arg4[%c0_5, %c0_6] : memref<128x128xbf16, #tpu.memory_space<vmem>>, vector<128x128xbf16>
    tpu.vector_store %arg4[%c0_5, %c0_6], %7 {strides = array<i32>} : memref<128x128xbf16, #tpu.memory_space<vmem>>, vector<128x128xbf16>,
    return
  }
  func.func @transform_0(%arg0: i32) -> (i32, i32) {
    %c0_i32 = arith.constant 0 : i32
    %c0_i32_0 = arith.constant 0 : i32
    return %arg0, %c0_i32 : i32, i32
  }
  func.func @transform_1(%arg0: i32) -> (i32, i32) {
    %c0_i32 = arith.constant 0 : i32
    %c0_i32_0 = arith.constant 0 : i32
    %c0_i32_1 = arith.constant 0 : i32
    return %c0_i32, %c0_i32_0 : i32, i32
  }
  func.func @transform_2(%arg0: i32) -> (i32, i32) {
    %c0_i32 = arith.constant 0 : i32
    %c0_i32_0 = arith.constant 0 : i32
    %c0_i32_1 = arith.constant 0 : i32
    return %c0_i32, %c0_i32_0 : i32, i32
  }
  func.func @transform_3(%arg0: i32) -> (i32, i32) {
    %c0_i32 = arith.constant 0 : i32
    %c0_i32_0 = arith.constant 0 : i32
    return %arg0, %c0_i32 : i32, i32
  }
}

</mosaic_0001>

<bundles_post_ra>
// kernel: tpu_custom_call.1
= control target key start
LH: loop header
LB: loop body
LE: loop exit
PB: predicated region body
PF: predicated region fallthrough
CT: control target
= control target key end

     0   :  { %vm73_vm0 = vcmask 1040384   ;;  %vm74_vm1 = vcmask 1041408   ;;  %v418_v2 = vmov 65535   ;;  %vm48_vm2 = vcmask 23552   ;;  %s516_s0 = inlined_call_operand.vmem [shape: f32[128,3], index: 0, kind: input, shape index: {}]   ;;  %s517_s1 = inlined_call_operand.vmem [shape: bf16[3,128], index: 1, kind: input, shape index: {}]   ;;  %s518_s2 = inlined_call_operand.vmem [shape: f32[1,128], index: 2, kind: input, shape index: {}]   ;;  %s519_s3 = inlined_call_operand.hbm [shape: bf16[128,128], index: 3, kind: output, shape index: {}]  }
   0x1   :  { %v40_v0 = vld [vmem:[%s517_s1] sm:$0x3]  ;;  %v75_v3 = vsel %vm73_vm0, 4294967295, %v418_v2  ;;  %v17_v4 = vld [vmem:[%s516_s0 + $0x8] sm:$0xff]  ;;  %v18_v10 = vld [vmem:[%s516_s0 + $0x10] sm:$0xff] }
   0x2   :  { %v16_v1 = vld [vmem:[%s516_s0] sm:$0xff]  ;;  %v25_v6 = vld [vmem:[%s516_s0 + $0x48] sm:$0xff]  ;;  %v76_v7 = vsel %vm74_vm1, %v75_v3, 0  ;;  %v19_v11 = vld [vmem:[%s516_s0 + $0x18] sm:$0xff] }
   0x3   :  { %v24_v5 = vld [vmem:[%s516_s0 + $0x40] sm:$0xff]  ;;  %v32_v8 = vpack.c.bf16 %v17_v4, %v16_v1  ;;  %v26_v12 = vld [vmem:[%s516_s0 + $0x50] sm:$0xff]  ;;  %v78_v13 = vand.u32 %v76_v7, %v40_v0  ;;  %v27_v14 = vld [vmem:[%s516_s0 + $0x58] sm:$0xff]  ;;  %v33_v19 = vpack.c.bf16 %v19_v11, %v18_v10 }
   0x4   :  { %v36_v9 = vpack.c.bf16 %v25_v6, %v24_v5  ;;  %v20_v15 = vld [vmem:[%s516_s0 + $0x20] sm:$0xff]  ;;  %v21_v16 = vld [vmem:[%s516_s0 + $0x28] sm:$0xff]  ;;  %v37_v20 = vpack.c.bf16 %v27_v14, %v26_v12 }
   0x5   :  { %372 = vmatprep.mubr.msk.bf16.mxu0 %vm48_vm2, %v32_v8  ;;  %v28_v17 = vld [vmem:[%s516_s0 + $0x60] sm:$0xff]  ;;  %v29_v18 = vld [vmem:[%s516_s0 + $0x68] sm:$0xff]  ;;  %370 = vmatprep.subr.bf16.mxu0 %v78_v13  ;;  %v34_v21 = vpack.c.bf16 %v21_v16, %v20_v15 }
   0x6   :  { %380 = vmatprep.mubr.msk.bf16.mxu1 %vm48_vm2, %v36_v9  ;;  %388 = vmatprep.subr.bf16.mxu1 %v78_v13  ;;  %v38_v22 = vpack.c.bf16 %v29_v18, %v28_v17 }
   0x7   :  { %371 = vmatpush3.bf16.msra.mxu0 %v78_v13  ;;  %389 = vmatpush3.bf16.msra.mxu1 %v78_v13 }
   0x8   :  { %8 = vsyncpa [#allocation3], 0  ;;  %v22_v23 = vld [vmem:[%s516_s0 + $0x30] sm:$0xff]  ;;  %v23_v24 = vld [vmem:[%s516_s0 + $0x38] sm:$0xff] }
   0x9   :  { %v30_v25 = vld [vmem:[%s516_s0 + $0x70] sm:$0xff]  ;;  %v31_v26 = vld [vmem:[%s516_s0 + $0x78] sm:$0xff]  ;;  %v35_v27 = vpack.c.bf16 %v23_v24, %v22_v23  ;;  %v273_v30 = vld [vmem:[%s518_s2] ss:$0 sm:$0xff]  ;;  %s419_s0 = smov [#allocation2]  }
   0xa   :  { %373 = vmatmul.mubr.msk.bf16.vlgmr.msra.gmra.mrb[0].mxu0 %vm48_vm2, %v33_v19  ;;  %381 = vmatmul.mubr.msk.bf16.vlgmr.msra.gmra.mrb[0].mxu1 %vm48_vm2, %v37_v20  ;;  %v39_v28 = vpack.c.bf16 %v31_v26, %v30_v25  ;;  %s262_s2 = sshll.u32 %s419_s0, 4  ;;  %s263_s2 = int_to_ptr.vmem [resolvable:$true] %s262_s2 }
   0xb   :  { %376 = vmatprep.mubr.msk.bf16.mxu0 %vm48_vm2, %v34_v21  ;;  %384 = vmatprep.mubr.msk.bf16.mxu1 %vm48_vm2, %v38_v22  ;;  %s394_s20 = scalar_lea.vmem %s263_s2, 1024  ;;  %p399_p1 = scmp.lt.s32.totalorder %s263_s2, %s263_s2 }
   0xc   :  { %p395_p0 = scmp.ne.s32.totalorder %s263_s2, %s394_s20  ;;  %p400_p2 = scmp.lt.s32.totalorder %s394_s20, %s394_s20 }
   0xe   :  { %p401_p3 = por %p400_p2, %p399_p1 }
  0x10   :  { %p402_p4 = pnand %p401_p3, %p395_p0 }
  0x12   :  { %377 = vmatmul.mubr.msk.bf16.gmra.mrb[4].mxu0 %vm48_vm2, %v35_v27  ;;  %385 = vmatmul.mubr.msk.bf16.gmra.mrb[4].mxu1 %vm48_vm2, %v39_v28 }
  0xdd   :  { %v374_v29 = vpop.f32.mrb[0].mxu0  ;;  %v382_v31 = vpop.f32.mrb[0].mxu1 }
  0xde   :  { %v114_v32 = vpop.f32.mrb[1].mxu0  ;;  %v146_v33 = vpop.f32.mrb[1].mxu1  ;;  %v123_v36 = vadd.f32 %v374_v29, %v273_v30  ;;  %v155_v37 = vadd.f32 %v382_v31, %v273_v30 }
  0xdf   :  { %v375_v34 = vpop.f32.mrb[2].mxu0  ;;  %v383_v35 = vpop.f32.mrb[2].mxu1  ;;  %v115_v42 = vadd.f32 %v273_v30, %v114_v32  ;;  %v147_v43 = vadd.f32 %v273_v30, %v146_v33 }
  0xe0   :  { %v126_v38 = vadd.f32 %v375_v34, %v273_v30  ;;  %v158_v39 = vadd.f32 %v383_v35, %v273_v30  ;;  %v117_v40 = vpop.f32.mrb[3].mxu0  ;;  %v149_v41 = vpop.f32.mrb[3].mxu1 }
  0xe1   :  { %v118_v44 = vadd.f32 %v273_v30, %v117_v40  ;;  %v150_v45 = vadd.f32 %v273_v30, %v149_v41 }
  0xe2   :  { %v322_v46 = vpack.c.bf16 %v126_v38, %v123_v36  ;;  %v342_v47 = vpack.c.bf16 %v158_v39, %v155_v37 }
  0xe3   :  { %v317_v48 = vpack.c.bf16 %v118_v44, %v115_v42  ;;  %v337_v49 = vpack.c.bf16 %v150_v45, %v147_v43 }
  0xe4   :  { %354 = vst [vmem:[#allocation2 + $0x8] sm:$0xff] %v322_v46   ;;  %358 = vst [vmem:[#allocation2 + $0x28] sm:$0xff] %v342_v47  }
  0xe5   :  { %318 = vst [vmem:[#allocation2] sm:$0xff] %v317_v48   ;;  %357 = vst [vmem:[#allocation2 + $0x20] sm:$0xff] %v337_v49   ;;  %v378_v50 = vpop.f32.mrb[4].mxu0  ;;  %v386_v51 = vpop.f32.mrb[4].mxu1 }
  0xe6   :  { %v130_v52 = vpop.f32.mrb[5].mxu0  ;;  %v162_v53 = vpop.f32.mrb[5].mxu1  ;;  %v139_v56 = vadd.f32 %v378_v50, %v273_v30  ;;  %v171_v57 = vadd.f32 %v386_v51, %v273_v30 }
  0xe7   :  { %v379_v54 = vpop.f32.mrb[6].mxu0  ;;  %v387_v55 = vpop.f32.mrb[6].mxu1  ;;  %v131_v62 = vadd.f32 %v273_v30, %v130_v52  ;;  %v163_v63 = vadd.f32 %v273_v30, %v162_v53 }
  0xe8   :  { %v142_v58 = vadd.f32 %v379_v54, %v273_v30  ;;  %v174_v59 = vadd.f32 %v387_v55, %v273_v30  ;;  %v133_v60 = vpop.f32.mrb[7].mxu0  ;;  %v165_v61 = vpop.f32.mrb[7].mxu1 }
  0xe9   :  { %v134_v0 = vadd.f32 %v273_v30, %v133_v60  ;;  %v166_v1 = vadd.f32 %v273_v30, %v165_v61 }
  0xea   :  { %v332_v2 = vpack.c.bf16 %v142_v58, %v139_v56  ;;  %v352_v3 = vpack.c.bf16 %v174_v59, %v171_v57 }
  0xeb   :  { %v327_v4 = vpack.c.bf16 %v134_v0, %v131_v62  ;;  %v347_v5 = vpack.c.bf16 %v166_v1, %v163_v63 }
  0xec   :  { %356 = vst [vmem:[#allocation2 + $0x18] sm:$0xff] %v332_v2   ;;  %360 = vst [vmem:[#allocation2 + $0x38] sm:$0xff] %v352_v3  }
  0xed   :  { %355 = vst [vmem:[#allocation2 + $0x10] sm:$0xff] %v327_v4   ;;  %359 = vst [vmem:[#allocation2 + $0x30] sm:$0xff] %v347_v5  }
  0xee   :  { %405 = shalt.err (!%p402_p4)
}
  0xef   :  { %s406_s22 = scalar_lea.hbm %s519_s3, 1024 }
  0xf0   :  { %p407_p5 = scmp.ne.s32.totalorder %s519_s3, %s406_s22  ;;  %p410_p6 = scmp.lt.u32.totalorder %s406_s22, %s519_s3 }
  0xf2   :  { %p412_p7 = pnand %p410_p6, %p407_p5 }
  0xf4   :  { %415 = shalt.err (!%p412_p7)
}
  0xf5   :  { %s420_s27 = smov 64   ;;  %s421_s28 = smov 4  }
  0xf6   :  { %268 = dma.vmem_to_hbm [thread:$0]  %s263_s2, 1024, %s519_s3, [#allocation3], %s420_s27, %s420_s27, %s421_s28  }
  0xf7   :  { %416 = dma.done.wait [#allocation3], 1024  }
  0xf8   :  { %417 = vsyncadd [#allocation3], 4294966272 }
  0xf9   :  { %272 = vsyncpa [#allocation3], 1 }

</bundles_post_ra>
